<compile_context>
chip_gen: v7x
topology: tpu7x:2x2x1
jax: 0.10.0
libtpu: 0.0.40
codegen_flags: <defaults>
</compile_context>

<pallas_src>
import functools
import math

import jax
import jax.numpy as jnp
from jax import lax
from jax.experimental import pallas as pl
from jax.experimental.pallas import tpu as pltpu

VMEM = pltpu.MemorySpace.VMEM
F32 = jnp.float32
BF16 = jnp.bfloat16


# ----------------------------------------------------------------------------
# Kernel 1: fused feature projection  y = relu(relu(x @ W1 + b1) @ W2 + b2)
# ----------------------------------------------------------------------------
def _feature_proj_kernel(x_ref, w1_ref, b1_ref, w2_ref, b2_ref, o_ref):
    h = jnp.dot(x_ref[...].astype(BF16), w1_ref[...],
                preferred_element_type=F32) + b1_ref[...]
    h = jnp.maximum(h, 0.0)
    h = jnp.dot(h.astype(BF16), w2_ref[...],
                preferred_element_type=F32) + b2_ref[...]
    o_ref[...] = jnp.maximum(h, 0.0)


def feature_projection(x2d, w1, b1, w2, b2):
    n = x2d.shape[0]
    out_f = w2.shape[1]
    return pl.pallas_call(
        _feature_proj_kernel,
        out_shape=jax.ShapeDtypeStruct((n, out_f), F32),
        in_specs=[pl.BlockSpec(memory_space=VMEM)] * 5,
        out_specs=pl.BlockSpec(memory_space=VMEM),
    )(x2d, w1, b1, w2, b2)


# ----------------------------------------------------------------------------
# Kernel 2: one bidirectional LSTM layer (both directions fused).
#   x_ref   : (T*B, in_f)  time-major rows (row t*B + b)
#   wih_ref : (in_f, 8H)   [fwd 4H | bwd 4H] stacked, bf16
#   b_ref   : (1, 8H)      b_ih + b_hh for both directions
#   whh*_ref: (H, 4H)      per-direction recurrent weights
#   out_ref : (T*B, 2H)    [fwd H | bwd H], PyTorch bidirectional layout
# PyTorch gate order: i, f, g, o.
# ----------------------------------------------------------------------------
def _bilstm_layer_kernel(x_ref, wih_ref, b_ref, whhf_ref, whhb_ref, out_ref,
                         xg_sc, hfseq_sc, hbseq_sc, *, T, B, H):
    # Stacked input projection for both directions: one (T*B, in) x (in, 8H).
    xg_sc[...] = jnp.dot(x_ref[...].astype(BF16), wih_ref[...],
                         preferred_element_type=F32) + b_ref[...]

    def cell(gates, c_prev):
        i = jax.nn.sigmoid(gates[:, 0 * H:1 * H])
        f = jax.nn.sigmoid(gates[:, 1 * H:2 * H])
        g = jnp.tanh(gates[:, 2 * H:3 * H])
        o = jax.nn.sigmoid(gates[:, 3 * H:4 * H])
        c = f * c_prev + i * g
        return o * jnp.tanh(c), c

    def step(t, carry):
        hf, cf, hb, cb = carry
        rt = T - 1 - t                      # backward direction time index
        gates_f = xg_sc[pl.ds(t * B, B), :4 * H] + jnp.dot(
            hf, whhf_ref[...], preferred_element_type=F32)
        gates_b = xg_sc[pl.ds(rt * B, B), 4 * H:] + jnp.dot(
            hb, whhb_ref[...], preferred_element_type=F32)
        hf, cf = cell(gates_f, cf)
        hb, cb = cell(gates_b, cb)
        hfseq_sc[pl.ds(t * B, B), :] = hf
        hbseq_sc[pl.ds(rt * B, B), :] = hb
        return hf, cf, hb, cb

    z = jnp.zeros((B, H), F32)
    lax.fori_loop(0, T, step, (z, z, z, z), unroll=True)
    # Single lane-dense write of the whole layer output.
    out_ref[...] = jnp.concatenate([hfseq_sc[...], hbseq_sc[...]], axis=-1)


def bilstm_layer(seq_tm, layer_p, *, T, B, H):
    wih, b, whhf, whhb = layer_p
    return pl.pallas_call(
        functools.partial(_bilstm_layer_kernel, T=T, B=B, H=H),
        out_shape=jax.ShapeDtypeStruct((T * B, 2 * H), F32),
        in_specs=[pl.BlockSpec(memory_space=VMEM)] * 5,
        out_specs=pl.BlockSpec(memory_space=VMEM),
        scratch_shapes=[pltpu.VMEM((T * B, 8 * H), F32),
                        pltpu.VMEM((T * B, H), F32),
                        pltpu.VMEM((T * B, H), F32)],
    )(seq_tm, wih, b, whhf, whhb)


# ----------------------------------------------------------------------------
# Kernel 3: fused multi-head self-attention + mean pooling + classifier MLP.
#   x_ref   : (B*T, E) batch-major rows (row b*T + t), E = 2H
#   outputs : pred (B, 1), attn (B, T, T) head-averaged probabilities
# ----------------------------------------------------------------------------
def _attn_classifier_kernel(x_ref, win_ref, bin_ref, wout_ref, bout_ref,
                            w1_ref, b1_ref, w2_ref, b2_ref,
                            w3_ref, b3_ref, w4_ref, b4_ref,
                            pred_ref, attn_ref, *, B, T, nH):
    E = x_ref.shape[-1]
    dh = E // nH
    scale = 1.0 / math.sqrt(dh)

    qkv = jnp.dot(x_ref[...].astype(BF16), win_ref[...],
                  preferred_element_type=F32) + bin_ref[...]      # (B*T, 3E)

    feats = []
    for b in range(B):                                            # B, nH static
        r0 = b * T
        attn_acc = jnp.zeros((T, T), F32)
        ctx_heads = []
        for h in range(nH):
            q = qkv[r0:r0 + T, h * dh:(h + 1) * dh]
            k = qkv[r0:r0 + T, E + h * dh:E + (h + 1) * dh]
            v = qkv[r0:r0 + T, 2 * E + h * dh:2 * E + (h + 1) * dh]
            s = lax.dot_general(q, k, (((1,), (1,)), ((), ())),
                                preferred_element_type=F32) * scale
            s = s - jnp.max(s, axis=-1, keepdims=True)
            p = jnp.exp(s)
            attn = p * pl.reciprocal(jnp.sum(p, axis=-1, keepdims=True),
                                     approx=True)
            attn_acc = attn_acc + attn
            ctx_heads.append(jnp.dot(attn, v, preferred_element_type=F32))
        attn_ref[b] = attn_acc * (1.0 / nH)                       # head mean
        ctx = jnp.concatenate(ctx_heads, axis=-1)                 # (T, E)
        attended = jnp.dot(ctx, wout_ref[...],
                           preferred_element_type=F32) + bout_ref[...]
        feats.append(jnp.mean(attended, axis=0, keepdims=True))   # temporal mean

    y = jnp.concatenate(feats, axis=0)                            # (B, E)
    y = jnp.maximum(jnp.dot(y, w1_ref[...], preferred_element_type=F32) + b1_ref[...], 0.0)
    y = jnp.maximum(jnp.dot(y, w2_ref[...], preferred_element_type=F32) + b2_ref[...], 0.0)
    y = jnp.maximum(jnp.dot(y, w3_ref[...], preferred_element_type=F32) + b3_ref[...], 0.0)
    pred_ref[...] = jax.nn.sigmoid(
        jnp.dot(y, w4_ref[...], preferred_element_type=F32) + b4_ref[...])


def attention_classifier(x_bm, params, *, B, T, nH):
    args = (x_bm, *params["attn_in"], *params["attn_out"],
            *params["cls1"], *params["cls2"], *params["cls3"], *params["cls4"])
    return pl.pallas_call(
        functools.partial(_attn_classifier_kernel, B=B, T=T, nH=nH),
        out_shape=(jax.ShapeDtypeStruct((B, 1), F32),
                   jax.ShapeDtypeStruct((B, T, T), F32)),
        in_specs=[pl.BlockSpec(memory_space=VMEM)] * 13,
        out_specs=(pl.BlockSpec(memory_space=VMEM),
                   pl.BlockSpec(memory_space=VMEM)),
    )(*args)


# ----------------------------------------------------------------------------
# Parameter init (deterministic, PyTorch-style uniform bounds).  All dense
# weights are stored pre-transposed (In, Out); big matmul weights in bf16.
# ----------------------------------------------------------------------------
def init_params(key, input_size=512, hidden_size=32, num_layers=3, num_heads=4):
    keys = iter(jax.random.split(key, 64))

    def uniform(shape, bound):
        return jax.random.uniform(next(keys), shape, F32, -bound, bound)

    def linear(out_f, in_f, w_dtype=F32):
        bound = 1.0 / math.sqrt(in_f)
        w = uniform((out_f, in_f), bound)          # PyTorch layout
        b = uniform((out_f,), bound)
        return w.T.astype(w_dtype), b.reshape(1, out_f)

    H = hidden_size
    E = 2 * H
    p = {"hidden_size": H, "num_heads": num_heads}

    # feature_projection: Linear(input,256) ReLU / Linear(256,128) ReLU
    p["fp1"] = linear(256, input_size, BF16)
    p["fp2"] = linear(128, 256, BF16)

    # 3-layer bidirectional LSTM; stack both directions' W_ih into (in_f, 8H)
    lstm = []
    for layer in range(num_layers):
        in_f = 128 if layer == 0 else E
        bound = 1.0 / math.sqrt(H)
        wih_cols, bias_cols, whh = [], [], []
        for _ in range(2):                         # fwd, bwd
            w_ih = uniform((4 * H, in_f), bound)
            w_hh = uniform((4 * H, H), bound)
            b_ih = uniform((4 * H,), bound)
            b_hh = uniform((4 * H,), bound)
            wih_cols.append(w_ih.T)                # (in_f, 4H)
            bias_cols.append(b_ih + b_hh)
            whh.append(w_hh.T)                     # (H, 4H)
        wih = jnp.concatenate(wih_cols, axis=1).astype(BF16)   # (in_f, 8H)
        b = jnp.concatenate(bias_cols).reshape(1, 8 * H)
        lstm.append((wih, b, whh[0], whh[1]))
    p["lstm"] = lstm

    # MultiheadAttention(embed_dim=E, heads=4): in_proj (3E,E), out_proj (E,E)
    p["attn_in"] = linear(3 * E, E, BF16)
    p["attn_out"] = linear(E, E)

    # uncertainty_classifier: E->256->128->64->1
    p["cls1"] = linear(256, E)
    p["cls2"] = linear(128, 256)
    p["cls3"] = linear(64, 128)
    p["cls4"] = linear(1, 64)
    return p


# ----------------------------------------------------------------------------
# Forward pass (inference semantics; dropout = identity)
# ----------------------------------------------------------------------------
def enhanced_temporal_bilstm_forward(params, x):
    B, T, F = x.shape
    H = params["hidden_size"]
    nH = params["num_heads"]

    # fused feature projection (row-wise, batch-major rows)
    feat = feature_projection(x.reshape(B * T, F), *params["fp1"], *params["fp2"])

    # switch to time-major once for the whole LSTM stack
    seq_tm = feat.reshape(B, T, -1).transpose(1, 0, 2).reshape(T * B, -1)

    for layer_p in params["lstm"]:
        seq_tm = bilstm_layer(seq_tm, layer_p, T=T, B=B, H=H)

    # back to batch-major once for attention + classifier
    lstm_bm = seq_tm.reshape(T, B, 2 * H).transpose(1, 0, 2).reshape(B * T, 2 * H)

    pred, attn_weights = attention_classifier(lstm_bm, params, B=B, T=T, nH=nH)
    return pred, attn_weights


if __name__ == "__main__":
    key = jax.random.PRNGKey(0)
    pkey, xkey = jax.random.split(key)

    # small but module-consistent shapes: batch=2, seq=8, rich features=512, hidden=32
    B, T, F, H = 2, 8, 512, 32
    params = init_params(pkey, input_size=F, hidden_size=H, num_layers=3, num_heads=4)
    x = jax.random.normal(xkey, (B, T, F), F32)

    pred, attn_w = enhanced_temporal_bilstm_forward(params, x)
    jax.block_until_ready((pred, attn_w))

    assert pred.shape == (B, 1)
    assert attn_w.shape == (B, T, T)
    assert bool(jnp.all(jnp.isfinite(pred))) and bool(jnp.all(jnp.isfinite(attn_w)))
    print("KERNEL_OK")
</pallas_src>

<mosaic_0001>
module attributes {stable_mosaic.version = 11 : i64} {
  func.func @_feature_proj_kernel(%arg0: memref<16x512xf32, #tpu.memory_space<vmem>>, %arg1: memref<512x256xbf16, #tpu.memory_space<vmem>>, %arg2: memref<1x256xf32, #tpu.memory_space<vmem>>, %arg3: memref<256x128xbf16, #tpu.memory_space<vmem>>, %arg4: memref<1x128xf32, #tpu.memory_space<vmem>>, %arg5: memref<16x128xf32, #tpu.memory_space<vmem>>) attributes {dimension_semantics = [], scalar_prefetch = 0 : i64, scratch_operands = 0 : i64, tpu.core_type = #tpu.core_type<tc>} {
    %c0 = arith.constant 0 : index
    %c0_0 = arith.constant 0 : index
    %0 = vector.load %arg0[%c0, %c0_0] : memref<16x512xf32, #tpu.memory_space<vmem>>, vector<16x512xf32>
    %1 = arith.truncf %0 : vector<16x512xf32> to vector<16x512xbf16>
    %c0_1 = arith.constant 0 : index
    %c0_2 = arith.constant 0 : index
    %2 = vector.load %arg1[%c0_1, %c0_2] : memref<512x256xbf16, #tpu.memory_space<vmem>>, vector<512x256xbf16>
    %cst = arith.constant dense<0.000000e+00> : vector<16x256xf32>
    %3 = tpu.matmul %1, %2, %cst {dimension_numbers = #tpu.dot_dimension_numbers<[1], [0], [0], [1], [0, 0, 1, 1], [], []>} : vector<16x512xbf16>, vector<512x256xbf16>, vector<16x256xf32> -> vector<16x256xf32>
    %c0_3 = arith.constant 0 : index
    %c0_4 = arith.constant 0 : index
    %4 = vector.load %arg2[%c0_3, %c0_4] : memref<1x256xf32, #tpu.memory_space<vmem>>, vector<1x256xf32>
    %5 = vector.broadcast %4 : vector<1x256xf32> to vector<16x256xf32>
    %6 = arith.addf %3, %5 : vector<16x256xf32>
    %cst_5 = arith.constant 0.000000e+00 : f32
    %7 = vector.broadcast %cst_5 : f32 to vector<16x256xf32>
    %8 = arith.maximumf %6, %7 : vector<16x256xf32>
    %9 = arith.truncf %8 : vector<16x256xf32> to vector<16x256xbf16>
    %c0_6 = arith.constant 0 : index
    %c0_7 = arith.constant 0 : index
    %10 = vector.load %arg3[%c0_6, %c0_7] : memref<256x128xbf16, #tpu.memory_space<vmem>>, vector<256x128xbf16>
    %cst_8 = arith.constant dense<0.000000e+00> : vector<16x128xf32>
    %11 = tpu.matmul %9, %10, %cst_8 {dimension_numbers = #tpu.dot_dimension_numbers<[1], [0], [0], [1], [0, 0, 1, 1], [], []>} : vector<16x256xbf16>, vector<256x128xbf16>, vector<16x128xf32> -> vector<16x128xf32>
    %c0_9 = arith.constant 0 : index
    %c0_10 = arith.constant 0 : index
    %12 = vector.load %arg4[%c0_9, %c0_10] : memref<1x128xf32, #tpu.memory_space<vmem>>, vector<1x128xf32>
    %13 = vector.broadcast %12 : vector<1x128xf32> to vector<16x128xf32>
    %14 = arith.addf %11, %13 : vector<16x128xf32>
    %cst_11 = arith.constant 0.000000e+00 : f32
    %15 = vector.broadcast %cst_11 : f32 to vector<16x128xf32>
    %16 = arith.maximumf %14, %15 : vector<16x128xf32>
    %c0_12 = arith.constant 0 : index
    %c0_13 = arith.constant 0 : index
    %17 = vector.load %arg5[%c0_12, %c0_13] : memref<16x128xf32, #tpu.memory_space<vmem>>, vector<16x128xf32>
    tpu.vector_store %arg5[%c0_12, %c0_13], %16 {strides = array<i32>} : memref<16x128xf32, #tpu.memory_space<vmem>>, vector<16x128xf32>,
    return
  }
}

</mosaic_0001>

<bundles_post_ra>
// kernel: tpu_custom_call.1
= control target key start
LH: loop header
LB: loop body
LE: loop exit
PB: predicated region body
PF: predicated region fallthrough
CT: control target
= control target key end

     0   :  { %10 = vsyncpa [#allocation3], 0  ;;  %s1188_s0 = inlined_call_operand.hbm [shape: f32[16,512], index: 0, kind: input, shape index: {}]   ;;  %s1189_s1 = inlined_call_operand.hbm [shape: bf16[512,256], index: 1, kind: input, shape index: {}]   ;;  %s1190_s2 = inlined_call_operand.vmem [shape: f32[1,256], index: 2, kind: input, shape index: {}]   ;;  %s1191_s3 = inlined_call_operand.hbm [shape: bf16[256,128], index: 3, kind: input, shape index: {}]   ;;  %s1192_s4 = inlined_call_operand.vmem [shape: f32[1,128], index: 4, kind: input, shape index: {}]   ;;  %s1193_s5 = inlined_call_operand.hbm [shape: f32[16,128], index: 5, kind: output, shape index: {}]  }
   0x1   :  { %11 = vsyncpa [#allocation6], 0 }
   0x2   :  { %12 = vsyncpa [#allocation4], 0  ;;  %s1088_s18 = smov [#allocation5]   ;;  %s994_s22 = scalar_lea.hbm %s1189_s1, 8192 }
   0x3   :  { %s30_s19 = sshll.u32 %s1088_s18, 4  ;;  %p995_p0 = scmp.ne.s32.totalorder %s1189_s1, %s994_s22  ;;  %s31_s19 = int_to_ptr.vmem [resolvable:$true] %s30_s19 }
   0x4   :  { %p998_p1 = scmp.lt.u32.totalorder %s994_s22, %s1189_s1 }
   0x6   :  { %p1000_p2 = pnand %p998_p1, %p995_p0 }
   0x8   :  { %1003 = shalt.err (!%p1000_p2)
}
   0x9   :  { %s1004_s27 = scalar_lea.vmem %s31_s19, 8192  ;;  %p1009_p4 = scmp.lt.s32.totalorder %s31_s19, %s31_s19 }
   0xa   :  { %p1005_p3 = scmp.ne.s32.totalorder %s31_s19, %s1004_s27  ;;  %p1010_p5 = scmp.lt.s32.totalorder %s1004_s27, %s1004_s27 }
   0xc   :  { %p1011_p6 = por %p1010_p5, %p1009_p4 }
   0xe   :  { %p1012_p7 = pnand %p1011_p6, %p1005_p3 }
  0x10   :  { %1015 = shalt.err (!%p1012_p7)
}
  0x11   :  { %s1089_s28 = smov 128   ;;  %s1090_s29 = smov 8  }
  0x12   :  { %36 = dma.hbm_to_vmem [thread:$0]  %s1189_s1, 8192, %s31_s19, [#allocation6], %s1089_s28, %s1089_s28, %s1090_s29  }
  0x13   :  { %s1091_s7 = smov [#allocation2]   ;;  %s1016_s11 = scalar_lea.hbm %s1188_s0, 1024 }
  0x14   :  { %s18_s8 = sshll.u32 %s1091_s7, 4  ;;  %p1017_p8 = scmp.ne.s32.totalorder %s1188_s0, %s1016_s11  ;;  %s19_s8 = int_to_ptr.vmem [resolvable:$true] %s18_s8 }
  0x15   :  { %p1020_p9 = scmp.lt.u32.totalorder %s1016_s11, %s1188_s0 }
  0x17   :  { %p1022_p10 = pnand %p1020_p9, %p1017_p8 }
  0x19   :  { %1025 = shalt.err (!%p1022_p10)
}
  0x1a   :  { %s1026_s16 = scalar_lea.vmem %s19_s8, 1024  ;;  %p1031_p12 = scmp.lt.s32.totalorder %s19_s8, %s19_s8 }
  0x1b   :  { %p1027_p11 = scmp.ne.s32.totalorder %s19_s8, %s1026_s16  ;;  %p1032_p13 = scmp.lt.s32.totalorder %s1026_s16, %s1026_s16 }
  0x1d   :  { %p1033_p0 = por %p1032_p13, %p1031_p12 }
  0x1f   :  { %p1034_p1 = pnand %p1033_p0, %p1027_p11 }
  0x21   :  { %1037 = shalt.err (!%p1034_p1)
}
  0x22   :  { %s1092_s1 = smov 512   ;;  %s1093_s17 = smov 32  }
  0x23   :  { %24 = dma.hbm_to_vmem [thread:$0]  %s1188_s0, 1024, %s19_s8, [#allocation3], %s1092_s1, %s1092_s1, %s1093_s17  }
  0x24   :  { %s1094_s20 = smov [#allocation7]   ;;  %s1038_s24 = scalar_lea.hbm %s1191_s3, 2048 }
  0x25   :  { %s44_s21 = sshll.u32 %s1094_s20, 4  ;;  %p1039_p2 = scmp.ne.s32.totalorder %s1191_s3, %s1038_s24  ;;  %s45_s21 = int_to_ptr.vmem [resolvable:$true] %s44_s21 }
  0x26   :  { %p1042_p3 = scmp.lt.u32.totalorder %s1038_s24, %s1191_s3 }
  0x28   :  { %p1044_p4 = pnand %p1042_p3, %p1039_p2 }
  0x2a   :  { %1047 = shalt.err (!%p1044_p4)
}
  0x2b   :  { %s1048_s6 = scalar_lea.vmem %s45_s21, 2048  ;;  %p1053_p6 = scmp.lt.s32.totalorder %s45_s21, %s45_s21 }
  0x2c   :  { %p1049_p5 = scmp.ne.s32.totalorder %s45_s21, %s1048_s6  ;;  %p1054_p7 = scmp.lt.s32.totalorder %s1048_s6, %s1048_s6 }
  0x2e   :  { %p1055_p8 = por %p1054_p7, %p1053_p6 }
  0x30   :  { %p1056_p9 = pnand %p1055_p8, %p1049_p5 }
  0x32   :  { %1059 = shalt.err (!%p1056_p9)
}
  0x33   :  { %s1095_s0 = smov 64   ;;  %s1096_s7 = smov 4  }
  0x34   :  { %50 = dma.hbm_to_vmem [thread:$0]  %s1191_s3, 2048, %s45_s21, [#allocation6], %s1095_s0, %s1095_s0, %s1096_s7  }
  0x35   :  { %1082 = dma.done.wait [#allocation3], 1024  }
  0x36   :  { %1083 = vsyncadd [#allocation3], 4294966272 }
  0x37   :  { %1084 = dma.done.wait [#allocation6], 10240  }
  0x38   :  { %1085 = vsyncadd [#allocation6], 4294957056  ;;  %v882_v0 = vld [vmem:[#allocation5 + $0x4] ss:$8 sps:$4 sm:$0xff]   ;;  %v886_v2 = vld [vmem:[#allocation5] ss:$8 sps:$4 sm:$0xff]  }
  0x39   :  { %v884_v1 = vld [vmem:[#allocation5 + $0x104] ss:$8 sps:$4 sm:$0xff]   ;;  %471 = vmatprep.subr.bf16.mxu1 %v882_v0  ;;  %v887_v3 = vld [vmem:[#allocation5 + $0x100] ss:$8 sps:$4 sm:$0xff]   ;;  %v888_v4 = vld [vmem:[#allocation5 + $0x14] ss:$8 sps:$4 sm:$0xff]  }
  0x3a   :  { %514 = vmatprep.subr.bf16.mxu0 %v884_v1  ;;  %472 = vmatpush1.bf16.msra.mxu1 %v886_v2  ;;  %v890_v5 = vld [vmem:[#allocation5 + $0x114] ss:$8 sps:$4 sm:$0xff]   ;;  %v892_v6 = vld [vmem:[#allocation5 + $0x10] ss:$8 sps:$4 sm:$0xff]   ;;  %v894_v8 = vld [vmem:[#allocation5 + $0x24] ss:$8 sps:$4 sm:$0xff]  }
  0x3b   :  { %515 = vmatpush1.bf16.msra.mxu0 %v887_v3  ;;  %473 = vmatprep.subr.bf16.mxu1 %v888_v4  ;;  %v893_v7 = vld [vmem:[#allocation5 + $0x110] ss:$8 sps:$4 sm:$0xff]   ;;  %v896_v9 = vld [vmem:[#allocation5 + $0x124] ss:$8 sps:$4 sm:$0xff]   ;;  %v898_v10 = vld [vmem:[#allocation5 + $0x20] ss:$8 sps:$4 sm:$0xff]  }
  0x3c   :  { %516 = vmatprep.subr.bf16.mxu0 %v890_v5  ;;  %v899_v11 = vld [vmem:[#allocation5 + $0x120] ss:$8 sps:$4 sm:$0xff]   ;;  %v900_v12 = vld [vmem:[#allocation5 + $0x34] ss:$8 sps:$4 sm:$0xff]   ;;  %v904_v14 = vld [vmem:[#allocation5 + $0x30] ss:$8 sps:$4 sm:$0xff]  }
  0x3d   :  { %v902_v13 = vld [vmem:[#allocation5 + $0x134] ss:$8 sps:$4 sm:$0xff]   ;;  %v905_v15 = vld [vmem:[#allocation5 + $0x130] ss:$8 sps:$4 sm:$0xff]   ;;  %v906_v16 = vld [vmem:[#allocation5 + $0x44] ss:$8 sps:$4 sm:$0xff]  }
  0x3e   :  { %474 = vmatpush1.bf16.msra.mxu1 %v892_v6  ;;  %v908_v17 = vld [vmem:[#allocation5 + $0x144] ss:$8 sps:$4 sm:$0xff]   ;;  %v910_v18 = vld [vmem:[#allocation5 + $0x40] ss:$8 sps:$4 sm:$0xff]   ;;  %v912_v20 = vld [vmem:[#allocation5 + $0x54] ss:$8 sps:$4 sm:$0xff]  }
  0x3f   :  { %517 = vmatpush1.bf16.msra.mxu0 %v893_v7  ;;  %475 = vmatprep.subr.bf16.mxu1 %v894_v8  ;;  %v911_v19 = vld [vmem:[#allocation5 + $0x140] ss:$8 sps:$4 sm:$0xff]   ;;  %v914_v21 = vld [vmem:[#allocation5 + $0x154] ss:$8 sps:$4 sm:$0xff]   ;;  %v916_v22 = vld [vmem:[#allocation5 + $0x50] ss:$8 sps:$4 sm:$0xff]  }
  0x40   :  { %518 = vmatprep.subr.bf16.mxu0 %v896_v9  ;;  %v917_v23 = vld [vmem:[#allocation5 + $0x150] ss:$8 sps:$4 sm:$0xff]   ;;  %v918_v24 = vld [vmem:[#allocation5 + $0x64] ss:$8 sps:$4 sm:$0xff]   ;;  %v922_v26 = vld [vmem:[#allocation5 + $0x60] ss:$8 sps:$4 sm:$0xff]  }
  0x41   :  { %v920_v25 = vld [vmem:[#allocation5 + $0x164] ss:$8 sps:$4 sm:$0xff]   ;;  %v923_v27 = vld [vmem:[#allocation5 + $0x160] ss:$8 sps:$4 sm:$0xff]   ;;  %v924_v28 = vld [vmem:[#allocation5 + $0x74] ss:$8 sps:$4 sm:$0xff]  }
  0x42   :  { %476 = vmatpush1.bf16.msra.mxu1 %v898_v10  ;;  %v926_v29 = vld [vmem:[#allocation5 + $0x174] ss:$8 sps:$4 sm:$0xff]   ;;  %v928_v30 = vld [vmem:[#allocation5 + $0x70] ss:$8 sps:$4 sm:$0xff]   ;;  %v930_v32 = vld [vmem:[#allocation5 + $0x84] ss:$8 sps:$4 sm:$0xff]  }
  0x43   :  { %519 = vmatpush1.bf16.msra.mxu0 %v899_v11  ;;  %477 = vmatprep.subr.bf16.mxu1 %v900_v12  ;;  %v929_v31 = vld [vmem:[#allocation5 + $0x170] ss:$8 sps:$4 sm:$0xff]   ;;  %v932_v33 = vld [vmem:[#allocation5 + $0x184] ss:$8 sps:$4 sm:$0xff]   ;;  %v934_v34 = vld [vmem:[#allocation5 + $0x80] ss:$8 sps:$4 sm:$0xff]  }
  0x44   :  { %520 = vmatprep.subr.bf16.mxu0 %v902_v13  ;;  %v935_v35 = vld [vmem:[#allocation5 + $0x180] ss:$8 sps:$4 sm:$0xff]   ;;  %v936_v36 = vld [vmem:[#allocation5 + $0x94] ss:$8 sps:$4 sm:$0xff]   ;;  %v940_v38 = vld [vmem:[#allocation5 + $0x90] ss:$8 sps:$4 sm:$0xff]  }
  0x45   :  { %v938_v37 = vld [vmem:[#allocation5 + $0x194] ss:$8 sps:$4 sm:$0xff]   ;;  %v941_v39 = vld [vmem:[#allocation5 + $0x190] ss:$8 sps:$4 sm:$0xff]   ;;  %v942_v40 = vld [vmem:[#allocation5 + $0xa4] ss:$8 sps:$4 sm:$0xff]  }
  0x46   :  { %478 = vmatpush1.bf16.msra.mxu1 %v904_v14  ;;  %v944_v41 = vld [vmem:[#allocation5 + $0x1a4] ss:$8 sps:$4 sm:$0xff]   ;;  %v946_v42 = vld [vmem:[#allocation5 + $0xa0] ss:$8 sps:$4 sm:$0xff]   ;;  %v948_v44 = vld [vmem:[#allocation5 + $0xb4] ss:$8 sps:$4 sm:$0xff]  }
  0x47   :  { %521 = vmatpush1.bf16.msra.mxu0 %v905_v15  ;;  %479 = vmatprep.subr.bf16.mxu1 %v906_v16  ;;  %v947_v43 = vld [vmem:[#allocation5 + $0x1a0] ss:$8 sps:$4 sm:$0xff]   ;;  %v950_v45 = vld [vmem:[#allocation5 + $0x1b4] ss:$8 sps:$4 sm:$0xff]   ;;  %v952_v50 = vld [vmem:[#allocation5 + $0xb0] ss:$8 sps:$4 sm:$0xff]  }
  0x48   :  { %522 = vmatprep.subr.bf16.mxu0 %v908_v17  ;;  %v64_v46 = vld [vmem:[#allocation2 + $0x8] sm:$0xff]  ;;  %v66_v48 = vld [vmem:[#allocation2 + $0x18] sm:$0xff]  ;;  %v63_v6 = vld [vmem:[#allocation2] sm:$0xff]  ;;  %s1097_s12 = smov [#allocation8]  }
  0x49   :  { %v68_v47 = vld [vmem:[#allocation2 + $0x28] sm:$0xff]  ;;  %v70_v49 = vld [vmem:[#allocation2 + $0x38] sm:$0xff]  ;;  %v67_v7 = vld [vmem:[#allocation2 + $0x20] sm:$0xff]  ;;  %s748_s13 = sshll.u32 %s1097_s12, 4  ;;  %s749_s13 = int_to_ptr.vmem [resolvable:$true] %s748_s13 }
  0x4a   :  { %480 = vmatpush1.bf16.msra.mxu1 %v910_v18  ;;  %v953_v51 = vld [vmem:[#allocation5 + $0x1b0] ss:$8 sps:$4 sm:$0xff]   ;;  %v954_v52 = vld [vmem:[#allocation5 + $0xc4] ss:$8 sps:$4 sm:$0xff]   ;;  %v72_v53 = vpack.c.bf16 %v68_v47, %v64_v46  ;;  %v74_v54 = vpack.c.bf16 %v70_v49, %v66_v48  ;;  %v958_v56 = vld [vmem:[#allocation5 + $0xc0] ss:$8 sps:$4 sm:$0xff]   ;;  %v71_v11 = vpack.c.bf16 %v67_v7, %v63_v6  ;;  %p1065_p11 = scmp.lt.s32.totalorder %s749_s13, %s749_s13 }
  0x4b   :  { %523 = vmatpush1.bf16.msra.mxu0 %v911_v19  ;;  %481 = vmatprep.subr.bf16.mxu1 %v912_v20  ;;  %v956_v55 = vld [vmem:[#allocation5 + $0x1c4] ss:$8 sps:$4 sm:$0xff]   ;;  %v959_v57 = vld [vmem:[#allocation5 + $0x1c0] ss:$8 sps:$4 sm:$0xff]   ;;  %v960_v58 = vld [vmem:[#allocation5 + $0xd4] ss:$8 sps:$4 sm:$0xff]  }
  0x4c   :  { %524 = vmatprep.subr.bf16.mxu0 %v914_v21  ;;  %503 = vmatprep.mubr.bf16.mxu1 %v72_v53  ;;  %v962_v59 = vld [vmem:[#allocation5 + $0x1d4] ss:$8 sps:$4 sm:$0xff]   ;;  %v964_v60 = vld [vmem:[#allocation5 + $0xd0] ss:$8 sps:$4 sm:$0xff]   ;;  %v966_v62 = vld [vmem:[#allocation5 + $0xe4] ss:$8 sps:$4 sm:$0xff]  }
  0x4d   :  { %546 = vmatprep.mubr.bf16.mxu0 %v74_v54  ;;  %v965_v61 = vld [vmem:[#allocation5 + $0x1d0] ss:$8 sps:$4 sm:$0xff]   ;;  %v968_v63 = vld [vmem:[#allocation5 + $0x1e4] ss:$8 sps:$4 sm:$0xff]   ;;  %v970_v0 = vld [vmem:[#allocation5 + $0xe0] ss:$8 sps:$4 sm:$0xff]  }
  0x4e   :  { %482 = vmatpush1.bf16.msra.mxu1 %v916_v22  ;;  %v971_v1 = vld [vmem:[#allocation5 + $0x1e0] ss:$8 sps:$4 sm:$0xff]   ;;  %v972_v2 = vld [vmem:[#allocation5 + $0xf4] ss:$8 sps:$4 sm:$0xff]   ;;  %v976_v4 = vld [vmem:[#allocation5 + $0xf0] ss:$8 sps:$4 sm:$0xff]  }
  0x4f   :  { %525 = vmatpush1.bf16.msra.mxu0 %v917_v23  ;;  %483 = vmatprep.subr.bf16.mxu1 %v918_v24  ;;  %v974_v3 = vld [vmem:[#allocation5 + $0x1f4] ss:$8 sps:$4 sm:$0xff]   ;;  %v977_v5 = vld [vmem:[#allocation5 + $0x1f0] ss:$8 sps:$4 sm:$0xff]   ;;  %v978_v10 = vld [vmem:[#allocation7 + $0x40] sm:$0xff]   ;;  %s1060_s14 = scalar_lea.vmem %s749_s13, 256 }
  0x50   :  { %526 = vmatprep.subr.bf16.mxu0 %v920_v25  ;;  %v65_v8 = vld [vmem:[#allocation2 + $0x10] sm:$0xff]  ;;  %v979_v13 = vld [vmem:[#allocation7] sm:$0xff]   ;;  %v980_v14 = vld [vmem:[#allocation7 + $0x48] sm:$0xff]   ;;  %p1061_p10 = scmp.ne.s32.totalorder %s749_s13, %s1060_s14  ;;  %p1066_p12 = scmp.lt.s32.totalorder %s1060_s14, %s1060_s14 }
  0x51   :  { %v69_v9 = vld [vmem:[#allocation2 + $0x30] sm:$0xff]  ;;  %v981_v15 = vld [vmem:[#allocation7 + $0x8] sm:$0xff]   ;;  %v984_v18 = vld [vmem:[#allocation7 + $0x58] sm:$0xff]  }
  0x52   :  { %484 = vmatpush1.bf16.msra.mxu1 %v922_v26  ;;  %v73_v12 = vpack.c.bf16 %v69_v9, %v65_v8  ;;  %v982_v16 = vld [vmem:[#allocation7 + $0x50] sm:$0xff]   ;;  %v985_v19 = vld [vmem:[#allocation7 + $0x18] sm:$0xff]   ;;  %v986_v20 = vld [vmem:[#allocation7 + $0x60] sm:$0xff]   ;;  %p1067_p13 = por %p1066_p12, %p1065_p11 }
  0x53   :  { %527 = vmatpush1.bf16.msra.mxu0 %v923_v27  ;;  %485 = vmatprep.subr.bf16.mxu1 %v924_v28  ;;  %v983_v17 = vld [vmem:[#allocation7 + $0x10] sm:$0xff]   ;;  %v987_v21 = vld [vmem:[#allocation7 + $0x20] sm:$0xff]   ;;  %v988_v22 = vld [vmem:[#allocation7 + $0x68] sm:$0xff]   ;;  %v141_v28 = vlaneseq }
  0x54   :  { %528 = vmatprep.subr.bf16.mxu0 %v926_v29  ;;  %v989_v23 = vld [vmem:[#allocation7 + $0x28] sm:$0xff]   ;;  %v990_v24 = vld [vmem:[#allocation7 + $0x70] sm:$0xff]   ;;  %v992_v26 = vld [vmem:[#allocation7 + $0x78] sm:$0xff]   ;;  %p1068_p0 = pnand %p1067_p13, %p1061_p10 }
  0x55   :  { %v991_v25 = vld [vmem:[#allocation7 + $0x30] sm:$0xff]   ;;  %v993_v27 = vld [vmem:[#allocation7 + $0x38] sm:$0xff]   ;;  %v142_v29 = vshrl.u32 %v141_v28, 7 }
  0x56   :  { %486 = vmatpush1.bf16.msra.mxu1 %v928_v30 }
  0x57   :  { %529 = vmatpush1.bf16.msra.mxu0 %v929_v31  ;;  %487 = vmatprep.subr.bf16.mxu1 %v930_v32  ;;  %v143_v30 = vsub.s32 0, %v142_v29  ;;  %v139_v31 = vld [vmem:[%s1190_s2] sm:$0x3]  ;;  %v147_v32 = vsub.s32 1, %v142_v29 }
  0x58   :  { %530 = vmatprep.subr.bf16.mxu0 %v932_v33 }
  0x59   :  { %v144_v33 = vrot.slane %v139_v31, %v143_v30 }
  0x5a   :  { %488 = vmatpush1.bf16.msra.mxu1 %v934_v34  ;;  %v148_v34 = vrot.slane %v139_v31, %v147_v32 }
  0x5b   :  { %531 = vmatpush1.bf16.msra.mxu0 %v935_v35  ;;  %489 = vmatprep.subr.bf16.mxu1 %v936_v36 }
  0x5c   :  { %532 = vmatprep.subr.bf16.mxu0 %v938_v37 }
  0x5e   :  { %490 = vmatpush1.bf16.msra.mxu1 %v940_v38 }
  0x5f   :  { %533 = vmatpush1.bf16.msra.mxu0 %v941_v39  ;;  %491 = vmatprep.subr.bf16.mxu1 %v942_v40 }
  0x60   :  { %534 = vmatprep.subr.bf16.mxu0 %v944_v41 }
  0x62   :  { %492 = vmatpush1.bf16.msra.mxu1 %v946_v42 }
  0x63   :  { %535 = vmatpush1.bf16.msra.mxu0 %v947_v43  ;;  %493 = vmatprep.subr.bf16.mxu1 %v948_v44 }
  0x64   :  { %536 = vmatprep.subr.bf16.mxu0 %v950_v45 }
  0x66   :  { %494 = vmatpush1.bf16.msra.mxu1 %v952_v50 }
  0x67   :  { %537 = vmatpush1.bf16.msra.mxu0 %v953_v51  ;;  %495 = vmatprep.subr.bf16.mxu1 %v954_v52 }
  0x68   :  { %538 = vmatprep.subr.bf16.mxu0 %v956_v55 }
  0x6a   :  { %496 = vmatpush1.bf16.msra.mxu1 %v958_v56 }
  0x6b   :  { %539 = vmatpush1.bf16.msra.mxu0 %v959_v57  ;;  %497 = vmatprep.subr.bf16.mxu1 %v960_v58  ;;  %v825_v58 = vld [vmem:[%s1192_s4] ss:$0 sm:$0xff] }
  0x6c   :  { %540 = vmatprep.subr.bf16.mxu0 %v962_v59 }
  0x6e   :  { %498 = vmatpush1.bf16.msra.mxu1 %v964_v60 }
  0x6f   :  { %541 = vmatpush1.bf16.msra.mxu0 %v965_v61  ;;  %499 = vmatprep.subr.bf16.mxu1 %v966_v62 }
  0x70   :  { %542 = vmatprep.subr.bf16.mxu0 %v968_v63 }
  0x72   :  { %500 = vmatpush1.bf16.msra.mxu1 %v970_v0 }
  0x73   :  { %543 = vmatpush1.bf16.msra.mxu0 %v971_v1  ;;  %501 = vmatprep.subr.bf16.mxu1 %v972_v2 }
  0x74   :  { %544 = vmatprep.subr.bf16.mxu0 %v974_v3 }
  0x76   :  { %502 = vmatpush1.bf16.msra.mxu1 %v976_v4 }
  0x77   :  { %545 = vmatpush1.bf16.msra.mxu0 %v977_v5  ;;  %842 = vmatprep.subr.bf16.mxu1 %v978_v10 }
  0x79   :  { %504 = vmatmul.mubr.bf16.vlgmr.msra.gmra.mrb[0].mxu1 %v71_v11 }
  0x7a   :  { %547 = vmatmul.mubr.bf16.vlgmr.msra.gmra.mrb[0].mxu0 %v73_v12  ;;  %843 = vmatpush3.bf16.msra.mxu1 %v979_v13 }
  0x7b   :  { %844 = vmatprep.subr.bf16.mxu1 %v980_v14 }
  0x7e   :  { %845 = vmatpush3.bf16.msra.mxu1 %v981_v15 }
  0x7f   :  { %846 = vmatprep.subr.bf16.mxu1 %v982_v16 }
  0x82   :  { %847 = vmatpush3.bf16.msra.mxu1 %v983_v17 }
  0x83   :  { %848 = vmatprep.subr.bf16.mxu1 %v984_v18 }
  0x86   :  { %849 = vmatpush3.bf16.msra.mxu1 %v985_v19 }
  0x87   :  { %850 = vmatprep.subr.bf16.mxu1 %v986_v20 }
  0x8a   :  { %851 = vmatpush3.bf16.msra.mxu1 %v987_v21 }
  0x8b   :  { %852 = vmatprep.subr.bf16.mxu1 %v988_v22 }
  0x8e   :  { %853 = vmatpush3.bf16.msra.mxu1 %v989_v23 }
  0x8f   :  { %854 = vmatprep.subr.bf16.mxu1 %v990_v24 }
  0x92   :  { %855 = vmatpush3.bf16.msra.mxu1 %v991_v25 }
  0x93   :  { %856 = vmatprep.subr.bf16.mxu1 %v992_v26 }
  0x96   :  { %857 = vmatpush3.bf16.msra.mxu1 %v993_v27 }
 0x14c   :  { %v505_v35 = vpop.f32.mrb[0].mxu1 }
 0x14d   :  { %v548_v36 = vpop.f32.mrb[0].mxu0  ;;  %v506_v37 = vadd.f32 %v505_v35, %v144_v33  ;;  %v507_v38 = vpop.f32.mrb[1].mxu1 }
 0x14e   :  { %v550_v39 = vpop.f32.mrb[1].mxu0  ;;  %v508_v40 = vadd.f32 %v507_v38, %v148_v34  ;;  %v509_v41 = vpop.f32.mrb[2].mxu1 }
 0x14f   :  { %v552_v42 = vpop.f32.mrb[2].mxu0  ;;  %v549_v43 = vadd.f32 %v548_v36, %v506_v37  ;;  %v510_v44 = vadd.f32 %v509_v41, %v144_v33  ;;  %v511_v45 = vpop.f32.mrb[3].mxu1 }
 0x150   :  { %v554_v46 = vpop.f32.mrb[3].mxu0  ;;  %v551_v47 = vadd.f32 %v550_v39, %v508_v40  ;;  %v512_v48 = vadd.f32 %v511_v45, %v148_v34 }
 0x151   :  { %v553_v49 = vadd.f32 %v552_v42, %v510_v44  ;;  %v557_v51 = vmax.f32 %v549_v43, 0.0 }
 0x152   :  { %v555_v50 = vadd.f32 %v554_v46, %v512_v48  ;;  %v558_v53 = vmax.f32 %v551_v47, 0.0 }
 0x153   :  { %v559_v52 = vmax.f32 %v553_v49, 0.0 }
 0x154   :  { %v560_v54 = vmax.f32 %v555_v50, 0.0 }
 0x155   :  { %v561_v55 = vpack.c.bf16 %v559_v52, %v557_v51 }
 0x156   :  { %v562_v56 = vpack.c.bf16 %v560_v54, %v558_v53 }
 0x158   :  { %730 = vmatprep.mubr.bf16.mxu1 %v562_v56 }
 0x159   :  { %731 = vmatmul.mubr.bf16.vlgmr.msra.gmra.mrb[4].mxu1 %v561_v55 }
 0x22c   :  { %v858_v57 = vpop.f32.mrb[4].mxu1 }
 0x22d   :  { %v859_v59 = vpop.f32.mrb[5].mxu1 }
 0x22e   :  { %v860_v60 = vadd.f32 %v859_v59, %v858_v57  ;;  %v861_v61 = vpop.f32.mrb[6].mxu1 }
 0x22f   :  { %v862_v62 = vpop.f32.mrb[7].mxu1 }
 0x230   :  { %v733_v63 = vadd.f32 %v860_v60, %v825_v58  ;;  %v863_v0 = vadd.f32 %v862_v62, %v861_v61 }
 0x232   :  { %v739_v1 = vmax.f32 %v733_v63, 0.0  ;;  %v736_v2 = vadd.f32 %v863_v0, %v825_v58 }
 0x234   :  { %741 = vst [vmem:[#allocation8] sm:$0xff] %v739_v1  ;;  %v740_v3 = vmax.f32 %v736_v2, 0.0 }
 0x236   :  { %742 = vst [vmem:[#allocation8 + $0x8] sm:$0xff] %v740_v3 }
 0x237   :  { %1071 = shalt.err (!%p1068_p0)
}
 0x238   :  { %s1072_s16 = scalar_lea.hbm %s1193_s5, 256 }
 0x239   :  { %p1073_p1 = scmp.ne.s32.totalorder %s1193_s5, %s1072_s16  ;;  %p1076_p2 = scmp.lt.u32.totalorder %s1072_s16, %s1193_s5 }
 0x23b   :  { %p1078_p3 = pnand %p1076_p2, %p1073_p1 }
 0x23d   :  { %1081 = shalt.err (!%p1078_p3)
}
 0x23e   :  { %754 = dma.vmem_to_hbm [thread:$0]  %s749_s13, 256, %s1193_s5, [#allocation4], %s1089_s28, %s1089_s28, %s1090_s29  }
 0x23f   :  { %1086 = dma.done.wait [#allocation4], 256  }
 0x240   :  { %1087 = vsyncadd [#allocation4], 4294967040 }
 0x241   :  { %758 = vsyncpa [#allocation3], 1 }
 0x242   :  { %759 = vsyncpa [#allocation6], 1 }
 0x243   :  { %760 = vsyncpa [#allocation4], 1 }

</bundles_post_ra>
